<compile_context>
chip_gen: v5e
topology: v5e:2x2
jax: 0.10.0
libtpu: 0.0.40
codegen_flags: <defaults>
</compile_context>

<pallas_src>
import functools
import math

import jax
import jax.numpy as jnp
from jax.experimental import pallas as pl
from jax.experimental.pallas import tpu as pltpu


def make_pe_table(d_model, max_len=5000, dtype=jnp.float32):
    """Deterministic sinusoidal table, identical to the torch __init__."""
    position = jnp.arange(0, max_len, dtype=jnp.float32)[:, None]          # (L, 1)
    div_term = jnp.exp(
        jnp.arange(0, d_model, 2, dtype=jnp.float32)
        * (-math.log(10000.0) / d_model)
    )                                                                      # (D/2,)
    pe = jnp.zeros((max_len, d_model), dtype=jnp.float32)
    pe = pe.at[:, 0::2].set(jnp.sin(position * div_term))
    pe = pe.at[:, 1::2].set(jnp.cos(position * div_term))
    return pe.astype(dtype)


def _pe_kernel(*refs, batch, d_model, p_drop, train):
    """refs = (x, pe[, u], out).

    x / u / out tiles: (ts, batch*d_model) lane-dense.   pe tile: (ts, d_model).
    """
    if train:
        x_ref, pe_ref, u_ref, o_ref = refs
    else:
        x_ref, pe_ref, o_ref = refs
        u_ref = None

    pe = pe_ref[...]                                   # (ts, D), already x.dtype
    if train:
        scale = jnp.asarray(1.0 / (1.0 - p_drop), pe.dtype)

    # Static per-batch lane slices: pure VPU adds, dense stores when d_model
    # is a multiple of 128; avoids any in-kernel broadcast/relayout of pe.
    for b in range(batch):
        sl = slice(b * d_model, (b + 1) * d_model)
        y = x_ref[:, sl] + pe
        if train:
            keep = u_ref[:, sl] >= jnp.float32(p_drop)
            y = jnp.where(keep, y * scale, jnp.zeros_like(y))
        o_ref[:, sl] = y.astype(o_ref.dtype)


def _rows_per_tile(seq_len, lanes, d_model, itemsize, with_dropout):
    """Rows per grid step so the double-buffered working set stays ~<=12 MiB."""
    bytes_per_row = 2 * lanes * itemsize + d_model * itemsize   # x + out + pe
    if with_dropout:
        bytes_per_row += lanes * 4                              # f32 uniforms
    budget = 12 * 1024 * 1024
    rows = max(1, (budget // 2) // bytes_per_row)               # /2: double-buffered
    if rows >= seq_len:
        return seq_len
    rows = max(8, (rows // 8) * 8)                              # sublane-aligned tiles
    return min(rows, seq_len)


def positional_encoding(x, pe_table, *, p_drop=0.1, train=False, rng_key=None):
    """x: (S, B, D); pe_table: (max_len, D).  Returns dropout(x + pe[:S])."""
    S, B, D = x.shape
    dtype = x.dtype
    lanes = B * D

    use_dropout = bool(train) and p_drop > 0.0
    if use_dropout and p_drop >= 1.0:        # degenerate nn.Dropout(p=1.0)
        return jnp.zeros_like(x)

    x2d = x.reshape(S, lanes)                # free, row-major contiguous view
    pe2d = pe_table[:S].astype(dtype)        # (S, D), cast once (halves DMA for bf16)

    ts = _rows_per_tile(S, lanes, D, jnp.dtype(dtype).itemsize, use_dropout)
    grid = (pl.cdiv(S, ts),)

    in_specs = [
        pl.BlockSpec((ts, lanes), lambda i: (i, 0)),   # x
        pl.BlockSpec((ts, D), lambda i: (i, 0)),       # pe slice
    ]
    args = [x2d, pe2d]

    if use_dropout:
        # TODO(synk): on a real-TPU-only deployment, switch to the on-chip PRNG
        # (pltpu.prng_seed(seed + pl.program_id(0)) + pltpu.prng_random_bits) to
        # avoid this extra x-sized HBM read; host uniforms are used here so the
        # kernel also lowers in interpret/CPU environments.
        if rng_key is None:
            rng_key = jax.random.PRNGKey(0)
        u = jax.random.uniform(rng_key, (S, lanes), dtype=jnp.float32)
        in_specs.append(pl.BlockSpec((ts, lanes), lambda i: (i, 0)))
        args.append(u)

    kernel = functools.partial(
        _pe_kernel, batch=B, d_model=D, p_drop=float(p_drop), train=use_dropout
    )

    y2d = pl.pallas_call(
        kernel,
        out_shape=jax.ShapeDtypeStruct((S, lanes), dtype),
        grid=grid,
        in_specs=in_specs,
        out_specs=pl.BlockSpec((ts, lanes), lambda i: (i, 0)),
        compiler_params=pltpu.CompilerParams(
            dimension_semantics=("parallel",),   # megacore split on v7x
        ),
    )(*args)
    return y2d.reshape(S, B, D)


if __name__ == "__main__":
    # Small shapes consistent with the module's (S, N, E) forward convention.
    seq_len, batch, d_model, max_len = 8, 2, 32, 64

    key = jax.random.PRNGKey(0)
    x = jax.random.normal(key, (seq_len, batch, d_model), dtype=jnp.float32)
    pe_table = make_pe_table(d_model, max_len=max_len)

    # Eval mode: dropout is identity (matches module.eval() in torch).
    y = jax.block_until_ready(
        positional_encoding(x, pe_table, p_drop=0.1, train=False)
    )
    ref = x + pe_table[:seq_len][:, None, :]
    assert y.shape == (seq_len, batch, d_model)
    assert jnp.allclose(y, ref, atol=1e-6, rtol=1e-6)

    # Training path: inverted dropout; each element is either 0 or scaled (x+pe).
    p = 0.1
    y_tr = jax.block_until_ready(
        positional_encoding(x, pe_table, p_drop=p, train=True,
                            rng_key=jax.random.PRNGKey(123))
    )
    assert y_tr.shape == (seq_len, batch, d_model)
    scaled = ref / (1.0 - p)
    is_dropped = jnp.abs(y_tr) <= 1e-6
    is_kept = jnp.abs(y_tr - scaled) <= 1e-5
    assert bool(jnp.all(is_dropped | is_kept))

    print("KERNEL_OK")
</pallas_src>

<mosaic_0001>
module attributes {stable_mosaic.version = 11 : i64} {
  func.func @_pe_kernel(%arg0: i32, %arg1: memref<8x64xf32, #tpu.memory_space<vmem>>, %arg2: memref<8x32xf32, #tpu.memory_space<vmem>>, %arg3: memref<8x64xf32, #tpu.memory_space<vmem>>) attributes {dimension_semantics = [#tpu.dimension_semantics<parallel>], iteration_bounds = array<i64: 1>, scalar_prefetch = 0 : i64, scratch_operands = 0 : i64, tpu.core_type = #tpu.core_type<tc>, window_params = [{transform_indices = @transform_0, window_bounds = array<i64: 8, 64>}, {transform_indices = @transform_1, window_bounds = array<i64: 8, 32>}, {transform_indices = @transform_2, window_bounds = array<i64: 8, 64>}]} {
    %c0 = arith.constant 0 : index
    %c0_0 = arith.constant 0 : index
    %0 = vector.load %arg2[%c0, %c0_0] : memref<8x32xf32, #tpu.memory_space<vmem>>, vector<8x32xf32>
    %c0_1 = arith.constant 0 : index
    %c0_2 = arith.constant 0 : index
    %1 = vector.load %arg1[%c0_1, %c0_2] : memref<8x64xf32, #tpu.memory_space<vmem>>, vector<8x32xf32>
    %2 = arith.addf %1, %0 : vector<8x32xf32>
    %c0_3 = arith.constant 0 : index
    %c0_4 = arith.constant 0 : index
    %3 = vector.load %arg3[%c0_3, %c0_4] : memref<8x64xf32, #tpu.memory_space<vmem>>, vector<8x32xf32>
    tpu.vector_store %arg3[%c0_3, %c0_4], %2 {strides = array<i32>} : memref<8x64xf32, #tpu.memory_space<vmem>>, vector<8x32xf32>,
    %c0_5 = arith.constant 0 : index
    %c32 = arith.constant 32 : index
    %4 = vector.load %arg1[%c0_5, %c32] : memref<8x64xf32, #tpu.memory_space<vmem>>, vector<8x32xf32>
    %5 = arith.addf %4, %0 : vector<8x32xf32>
    %c0_6 = arith.constant 0 : index
    %c32_7 = arith.constant 32 : index
    %6 = vector.load %arg3[%c0_6, %c32_7] : memref<8x64xf32, #tpu.memory_space<vmem>>, vector<8x32xf32>
    tpu.vector_store %arg3[%c0_6, %c32_7], %5 {strides = array<i32>} : memref<8x64xf32, #tpu.memory_space<vmem>>, vector<8x32xf32>,
    return
  }
  func.func @transform_0(%arg0: i32) -> (i32, i32) {
    %c0_i32 = arith.constant 0 : i32
    %c0_i32_0 = arith.constant 0 : i32
    return %arg0, %c0_i32 : i32, i32
  }
  func.func @transform_1(%arg0: i32) -> (i32, i32) {
    %c0_i32 = arith.constant 0 : i32
    %c0_i32_0 = arith.constant 0 : i32
    return %arg0, %c0_i32 : i32, i32
  }
  func.func @transform_2(%arg0: i32) -> (i32, i32) {
    %c0_i32 = arith.constant 0 : i32
    %c0_i32_0 = arith.constant 0 : i32
    return %arg0, %c0_i32 : i32, i32
  }
}

</mosaic_0001>

<bundles_post_ra>
// kernel: tpu_custom_call.1
= control target key start
LH: loop header
LB: loop body
LE: loop exit
PB: predicated region body
PF: predicated region fallthrough
CT: control target
= control target key end

     0   :  { %7 = vsyncpa [#allocation3], 0  ;;  %s181_s0 = inlined_call_operand.hbm [shape: f32[8,64], index: 0, kind: input, shape index: {}]   ;;  %s182_s1 = inlined_call_operand.hbm [shape: f32[8,32], index: 1, kind: input, shape index: {}]   ;;  %s183_s2 = inlined_call_operand.hbm [shape: f32[8,64], index: 2, kind: output, shape index: {}]  }
   0x1   :  { %8 = vsyncpa [#allocation6], 0 }
   0x2   :  { %9 = vsyncpa [#allocation4], 0  ;;  %s15_s11 = sshll.u32 %s181_s0, 4  ;;  %s153_s12 = smov [#allocation2]   ;;  %s16_s11 = int_to_ptr.hbm [resolvable:$true] %s15_s11 }
   0x3   :  { %s17_s13 = sshll.u32 %s153_s12, 4  ;;  %s26_s16 = sshll.u32 %s182_s1, 4  ;;  %s18_s13 = int_to_ptr.vmem [resolvable:$true] %s17_s13  ;;  %s27_s16 = int_to_ptr.hbm [resolvable:$true] %s26_s16 }
   0x4   :  { %20 = dma.hbm_to_vmem [thread:$0]  %s16_s11, 128, %s18_s13, [#allocation3]  }
   0x5   :  { %s154_s17 = smov [#allocation5]  }
   0x6   :  { %s28_s18 = sshll.u32 %s154_s17, 4  ;;  %s29_s18 = int_to_ptr.vmem [resolvable:$true] %s28_s18 }
   0x7   :  { %31 = dma.hbm_to_vmem [thread:$0]  %s27_s16, 128, %s29_s18, [#allocation6]  }
   0x8   :  { %147 = dma.done.wait [#allocation3], 128  }
   0x9   :  { %148 = vsyncadd [#allocation3], 4294967168 }
   0xa   :  { %149 = dma.done.wait [#allocation6], 128  }
   0xb   :  { %150 = vsyncadd [#allocation6], 4294967168  ;;  %v40_v0 = vld [vmem:[#allocation5] sm:$0xff]  ;;  %v41_v1 = vld [vmem:[#allocation2] sm:$0xff]  ;;  %vm43_vm0 = vcmask 261120   ;;  %s155_s0 = smov 32  }
   0xc   :  { %v42_v2 = vadd.f32 %v41_v1, %v40_v0  ;;  %47 = vrot.lane.b32.xlu0 %v40_v0, %s155_s0  ;;  %s156_s19 = smov [#allocation7]   ;;  %s60_s22 = sshll.u32 %s183_s2, 4  ;;  %vm51_vm1 = vcmask 523520   ;;  %s61_s22 = int_to_ptr.hbm [resolvable:$true] %s60_s22 }
   0xd   :  { %s58_s20 = sshll.u32 %s156_s19, 4  ;;  %s59_s20 = int_to_ptr.vmem [resolvable:$true] %s58_s20 }
   0xe   :  { %44 = vst.msk [vmem:[#allocation7] sm:$0xff] %vm43_vm0, %v42_v2 }
  0x7e   :  { %v48_v3 = vpop.permute.xlu0 %47 }
  0x7f   :  { %v50_v4 = vadd.f32 %v48_v3, %v41_v1 }
  0x81   :  { %52 = vst.msk [vmem:[#allocation7] sm:$0xff] %vm51_vm1, %v50_v4 }
  0x82   :  { %63 = dma.vmem_to_hbm [thread:$0]  %s59_s20, 128, %s61_s22, [#allocation4]  }
  0x83   :  { %151 = dma.done.wait [#allocation4], 128  }
  0x84   :  { %152 = vsyncadd [#allocation4], 4294967168 }
  0x85   :  { %68 = vsyncpa [#allocation3], 1 }
  0x86   :  { %69 = vsyncpa [#allocation6], 1 }
  0x87   :  { %70 = vsyncpa [#allocation4], 1 }

</bundles_post_ra>
